<compile_context>
chip_gen: v7x
topology: tpu7x:2x2x1
jax: 0.10.0
libtpu: 0.0.40
codegen_flags: <defaults>
</compile_context>

<pallas_src>
import jax
import jax.numpy as jnp
from jax import lax
from jax.experimental import pallas as pl
from jax.experimental.pallas import tpu as pltpu

EPS = 1e-5  # F.layer_norm default


def tdln_kernel(wb_ref, t_ref, x_ref, p_ref, o_ref):
    # wb_ref: SMEM (2,)        -> [w, b] scalar gate parameters
    # t_ref : VMEM (Bt, 1, 1)  -> per-row time scalars
    # x_ref : VMEM (Bt, R, L)  -> flattened per-sample feature block
    # p_ref : VMEM (4, R, L)   -> stacked [p1 - p2, p2, p3 - p4, p4]
    w = wb_ref[0]
    b = wb_ref[1]
    s = jax.nn.sigmoid(w * t_ref[...].astype(jnp.float32) + b)   # (Bt, 1, 1)

    x = x_ref[...].astype(jnp.float32)                           # (Bt, R, L)
    inv_n = jnp.float32(1.0 / (x.shape[1] * x.shape[2]))

    # Single-pass statistics: lane reduce, then sublane reduce (f32 accum).
    sum_x = jnp.sum(jnp.sum(x, axis=2, keepdims=True), axis=1, keepdims=True)
    sum_xx = jnp.sum(jnp.sum(x * x, axis=2, keepdims=True), axis=1,
                     keepdims=True)
    mean = sum_x * inv_n                                         # (Bt, 1, 1)
    var = jnp.maximum(sum_xx * inv_n - mean * mean, 0.0)
    inv = lax.rsqrt(var + EPS)
    xn = (x - mean) * inv

    dg = p_ref[0].astype(jnp.float32)    # p1 - p2
    g0 = p_ref[1].astype(jnp.float32)    # p2
    db = p_ref[2].astype(jnp.float32)    # p3 - p4
    b0 = p_ref[3].astype(jnp.float32)    # p4
    gamma = s * dg + g0                  # broadcast -> (Bt, R, L)
    beta = s * db + b0
    o_ref[...] = (gamma * xn + beta).astype(o_ref.dtype)


def _padded_slab_bytes(r, l, itemsize):
    """Physical VMEM bytes of one (r, l) slab after (8, 128) tile padding."""
    r_pad = -(-r // 8) * 8
    l_pad = -(-l // 128) * 128
    return r_pad * l_pad * itemsize


def _choose_block_rows(batch, row_bytes, budget_bytes=4 << 20):
    """Largest Bt <= batch whose per-step x block fits the VMEM budget."""
    bt = max(1, budget_bytes // max(row_bytes, 1))
    return int(min(bt, batch))


@jax.jit
def tdln_forward(x, t, w, b, p1, p2, p3, p4):
    """x: (B, C, H, W); t: (B,); w, b: (1,); p1..p4: (1, C, H, W)."""
    B, C, H, W = x.shape
    total = C * H * W
    if total % 128 == 0:
        R, L = total // 128, 128          # lane-dense, sublane-full view
    else:
        R, L = C, H * W                   # fallback (still correct)

    f32 = jnp.float32
    x3 = x.reshape(B, R, L)
    params = jnp.stack([
        (p1 - p2).reshape(R, L).astype(f32),   # dg
        p2.reshape(R, L).astype(f32),
        (p3 - p4).reshape(R, L).astype(f32),   # db
        p4.reshape(R, L).astype(f32),
    ])                                          # (4, R, L)
    wb = jnp.stack([w.reshape(()), b.reshape(())]).astype(f32)
    t3 = t.reshape(B, 1, 1).astype(f32)

    itemsize = jnp.dtype(x.dtype).itemsize
    row_bytes = _padded_slab_bytes(R, L, itemsize)
    Bt = _choose_block_rows(B, row_bytes)

    # Pad batch to a multiple of Bt (zero rows normalize harmlessly and are
    # sliced away below).  No-op when B already divides.
    B_pad = -(-B // Bt) * Bt
    if B_pad != B:
        x3 = jnp.pad(x3, ((0, B_pad - B), (0, 0), (0, 0)))
        t3 = jnp.pad(t3, ((0, B_pad - B), (0, 0), (0, 0)))
    grid = (B_pad // Bt,)

    x_spec = pl.BlockSpec((Bt, R, L), lambda i: (i, 0, 0))
    t_spec = pl.BlockSpec((Bt, 1, 1), lambda i: (i, 0, 0))
    p_spec = pl.BlockSpec((4, R, L), lambda i: (0, 0, 0))

    # VMEM budget: x & out double-buffered, stacked params double-buffered but
    # fetched only once (constant index map), t block tile-padded but tiny.
    needed = (4 * Bt * row_bytes                        # x + out, 2 bufs each
              + 2 * 4 * _padded_slab_bytes(R, L, 4)     # stacked f32 params
              + 2 * Bt * 8 * 128 * 4                    # t block, tile-padded
              + (4 << 20))                              # compiler headroom
    vmem_limit = int(min(max(needed, 32 << 20), 64 << 20))

    out = pl.pallas_call(
        tdln_kernel,
        out_shape=jax.ShapeDtypeStruct((B_pad, R, L), x.dtype),
        grid_spec=pl.GridSpec(
            grid=grid,
            in_specs=[
                pl.BlockSpec(memory_space=pltpu.SMEM),   # [w, b]
                t_spec,                                  # t
                x_spec,                                  # x
                p_spec,                                  # stacked params
            ],
            out_specs=x_spec,
        ),
        compiler_params=pltpu.CompilerParams(
            dimension_semantics=("parallel",),
            vmem_limit_bytes=vmem_limit,
        ),
    )(wb, t3, x3, params)
    return out[:B].reshape(B, C, H, W)


def tdln_reference(x, t, w, b, p1, p2, p3, p4):
    """Pure-JAX reference matching the PyTorch forward."""
    s = jax.nn.sigmoid(w * t + b)                  # (B,)
    s = s.reshape(s.shape[0], 1, 1, 1)
    gamma = s * p1 + (1.0 - s) * p2
    beta = s * p3 + (1.0 - s) * p4
    mean = jnp.mean(x, axis=(1, 2, 3), keepdims=True)
    var = jnp.mean((x - mean) ** 2, axis=(1, 2, 3), keepdims=True)
    xn = (x - mean) / jnp.sqrt(var + EPS)
    return gamma * xn + beta


if __name__ == "__main__":
    key = jax.random.PRNGKey(0)
    B, C, H, W = 2, 4, 16, 16
    feature_dim = (C, H, W)

    k_x, k_t, k_w, k_p1, k_p2, k_p3, k_p4 = jax.random.split(key, 7)
    x = jax.random.normal(k_x, (B, C, H, W), dtype=jnp.float32)
    t = jax.random.uniform(k_t, (B,), dtype=jnp.float32)

    # Deterministic parameter init mirroring the PyTorch __init__.
    w = 0.02 * jax.random.normal(k_w, (1,), dtype=jnp.float32)   # normal(0, 0.02)
    b = jnp.zeros((1,), dtype=jnp.float32)                       # zeros
    p1 = jax.random.normal(k_p1, (1, *feature_dim), dtype=jnp.float32)
    p2 = jax.random.normal(k_p2, (1, *feature_dim), dtype=jnp.float32)
    p3 = jax.random.normal(k_p3, (1, *feature_dim), dtype=jnp.float32)
    p4 = jax.random.normal(k_p4, (1, *feature_dim), dtype=jnp.float32)

    out = tdln_forward(x, t, w, b, p1, p2, p3, p4)
    out = jax.block_until_ready(out)

    ref = tdln_reference(x, t, w[0], b[0], p1, p2, p3, p4)
    assert out.shape == (B, C, H, W)
    assert jnp.allclose(out, ref, atol=1e-4, rtol=1e-4), "mismatch vs reference"

    print("KERNEL_OK")
</pallas_src>

<mosaic_0001>
module attributes {stable_mosaic.version = 11 : i64} {
  func.func @tdln_kernel(%arg0: i32, %arg1: memref<2xf32, #tpu.memory_space<smem>>, %arg2: memref<2x1x1xf32, #tpu.memory_space<vmem>>, %arg3: memref<2x8x128xf32, #tpu.memory_space<vmem>>, %arg4: memref<4x8x128xf32, #tpu.memory_space<vmem>>, %arg5: memref<2x8x128xf32, #tpu.memory_space<vmem>>) attributes {dimension_semantics = [#tpu.dimension_semantics<parallel>], iteration_bounds = array<i64: 1>, scalar_prefetch = 0 : i64, scratch_operands = 0 : i64, tpu.core_type = #tpu.core_type<tc>, window_params = [{transform_indices = @transform_0, window_bounds = array<i64: 2>}, {transform_indices = @transform_1, window_bounds = array<i64: 2, 1, 1>}, {transform_indices = @transform_2, window_bounds = array<i64: 2, 8, 128>}, {pipeline_mode = #tpu.pipeline_mode<synchronous>, transform_indices = @transform_3, window_bounds = array<i64: 4, 8, 128>}, {transform_indices = @transform_4, window_bounds = array<i64: 2, 8, 128>}]} {
    %c0 = arith.constant 0 : index
    %0 = memref.load %arg1[%c0] : memref<2xf32, #tpu.memory_space<smem>>
    %c1 = arith.constant 1 : index
    %1 = memref.load %arg1[%c1] : memref<2xf32, #tpu.memory_space<smem>>
    %c0_0 = arith.constant 0 : index
    %c0_1 = arith.constant 0 : index
    %c0_2 = arith.constant 0 : index
    %2 = vector.load %arg2[%c0_0, %c0_1, %c0_2] : memref<2x1x1xf32, #tpu.memory_space<vmem>>, vector<2x1x1xf32>
    %3 = vector.broadcast %0 : f32 to vector<2x1x1xf32>
    %4 = arith.mulf %3, %2 : vector<2x1x1xf32>
    %5 = vector.broadcast %1 : f32 to vector<2x1x1xf32>
    %6 = arith.addf %4, %5 : vector<2x1x1xf32>
    %7 = arith.negf %6 : vector<2x1x1xf32>
    %8 = math.exp %7 : vector<2x1x1xf32>
    %cst = arith.constant 1.000000e+00 : f32
    %9 = vector.broadcast %cst : f32 to vector<2x1x1xf32>
    %10 = arith.addf %9, %8 : vector<2x1x1xf32>
    %11 = arith.divf %9, %10 : vector<2x1x1xf32>
    %c0_3 = arith.constant 0 : index
    %c0_4 = arith.constant 0 : index
    %c0_5 = arith.constant 0 : index
    %12 = vector.load %arg3[%c0_3, %c0_4, %c0_5] : memref<2x8x128xf32, #tpu.memory_space<vmem>>, vector<2x8x128xf32>
    %cst_6 = arith.constant dense<0.000000e+00> : vector<2x8xf32>
    %13 = vector.multi_reduction <add>, %12, %cst_6 [2] : vector<2x8x128xf32> to vector<2x8xf32>
    %14 = vector.shape_cast %13 : vector<2x8xf32> to vector<2x8x1xf32>
    %cst_7 = arith.constant dense<0.000000e+00> : vector<2x1xf32>
    %15 = vector.multi_reduction <add>, %14, %cst_7 [1] : vector<2x8x1xf32> to vector<2x1xf32>
    %16 = vector.shape_cast %15 : vector<2x1xf32> to vector<2x1x1xf32>
    %17 = arith.mulf %12, %12 : vector<2x8x128xf32>
    %cst_8 = arith.constant dense<0.000000e+00> : vector<2x8xf32>
    %18 = vector.multi_reduction <add>, %17, %cst_8 [2] : vector<2x8x128xf32> to vector<2x8xf32>
    %19 = vector.shape_cast %18 : vector<2x8xf32> to vector<2x8x1xf32>
    %cst_9 = arith.constant dense<0.000000e+00> : vector<2x1xf32>
    %20 = vector.multi_reduction <add>, %19, %cst_9 [1] : vector<2x8x1xf32> to vector<2x1xf32>
    %21 = vector.shape_cast %20 : vector<2x1xf32> to vector<2x1x1xf32>
    %cst_10 = arith.constant 9.765625E-4 : f32
    %22 = vector.broadcast %cst_10 : f32 to vector<2x1x1xf32>
    %23 = arith.mulf %16, %22 : vector<2x1x1xf32>
    %cst_11 = arith.constant 9.765625E-4 : f32
    %24 = vector.broadcast %cst_11 : f32 to vector<2x1x1xf32>
    %25 = arith.mulf %21, %24 : vector<2x1x1xf32>
    %26 = arith.mulf %23, %23 : vector<2x1x1xf32>
    %27 = arith.subf %25, %26 : vector<2x1x1xf32>
    %cst_12 = arith.constant 0.000000e+00 : f32
    %28 = vector.broadcast %cst_12 : f32 to vector<2x1x1xf32>
    %29 = arith.maximumf %27, %28 : vector<2x1x1xf32>
    %cst_13 = arith.constant 9.99999974E-6 : f32
    %30 = vector.broadcast %cst_13 : f32 to vector<2x1x1xf32>
    %31 = arith.addf %29, %30 : vector<2x1x1xf32>
    %32 = math.rsqrt %31 : vector<2x1x1xf32>
    %33 = vector.broadcast %23 : vector<2x1x1xf32> to vector<2x8x128xf32>
    %34 = arith.subf %12, %33 : vector<2x8x128xf32>
    %35 = vector.broadcast %32 : vector<2x1x1xf32> to vector<2x8x128xf32>
    %36 = arith.mulf %34, %35 : vector<2x8x128xf32>
    %c0_14 = arith.constant 0 : index
    %c0_15 = arith.constant 0 : index
    %c0_16 = arith.constant 0 : index
    %37 = vector.load %arg4[%c0_14, %c0_15, %c0_16] : memref<4x8x128xf32, #tpu.memory_space<vmem>>, vector<1x8x128xf32>
    %38 = vector.shape_cast %37 : vector<1x8x128xf32> to vector<8x128xf32>
    %c1_17 = arith.constant 1 : index
    %c0_18 = arith.constant 0 : index
    %c0_19 = arith.constant 0 : index
    %39 = vector.load %arg4[%c1_17, %c0_18, %c0_19] : memref<4x8x128xf32, #tpu.memory_space<vmem>>, vector<1x8x128xf32>
    %40 = vector.shape_cast %39 : vector<1x8x128xf32> to vector<8x128xf32>
    %c2 = arith.constant 2 : index
    %c0_20 = arith.constant 0 : index
    %c0_21 = arith.constant 0 : index
    %41 = vector.load %arg4[%c2, %c0_20, %c0_21] : memref<4x8x128xf32, #tpu.memory_space<vmem>>, vector<1x8x128xf32>
    %42 = vector.shape_cast %41 : vector<1x8x128xf32> to vector<8x128xf32>
    %c3 = arith.constant 3 : index
    %c0_22 = arith.constant 0 : index
    %c0_23 = arith.constant 0 : index
    %43 = vector.load %arg4[%c3, %c0_22, %c0_23] : memref<4x8x128xf32, #tpu.memory_space<vmem>>, vector<1x8x128xf32>
    %44 = vector.shape_cast %43 : vector<1x8x128xf32> to vector<8x128xf32>
    %45 = vector.shape_cast %38 : vector<8x128xf32> to vector<1x8x128xf32>
    %46 = vector.broadcast %11 : vector<2x1x1xf32> to vector<2x8x128xf32>
    %47 = vector.broadcast %45 : vector<1x8x128xf32> to vector<2x8x128xf32>
    %48 = arith.mulf %46, %47 : vector<2x8x128xf32>
    %49 = vector.shape_cast %40 : vector<8x128xf32> to vector<1x8x128xf32>
    %50 = vector.broadcast %49 : vector<1x8x128xf32> to vector<2x8x128xf32>
    %51 = arith.addf %48, %50 : vector<2x8x128xf32>
    %52 = vector.shape_cast %42 : vector<8x128xf32> to vector<1x8x128xf32>
    %53 = vector.broadcast %11 : vector<2x1x1xf32> to vector<2x8x128xf32>
    %54 = vector.broadcast %52 : vector<1x8x128xf32> to vector<2x8x128xf32>
    %55 = arith.mulf %53, %54 : vector<2x8x128xf32>
    %56 = vector.shape_cast %44 : vector<8x128xf32> to vector<1x8x128xf32>
    %57 = vector.broadcast %56 : vector<1x8x128xf32> to vector<2x8x128xf32>
    %58 = arith.addf %55, %57 : vector<2x8x128xf32>
    %59 = arith.mulf %51, %36 : vector<2x8x128xf32>
    %60 = arith.addf %59, %58 : vector<2x8x128xf32>
    %c0_24 = arith.constant 0 : index
    %c0_25 = arith.constant 0 : index
    %c0_26 = arith.constant 0 : index
    %61 = vector.load %arg5[%c0_24, %c0_25, %c0_26] : memref<2x8x128xf32, #tpu.memory_space<vmem>>, vector<2x8x128xf32>
    tpu.vector_store %arg5[%c0_24, %c0_25, %c0_26], %60 {strides = array<i32>} : memref<2x8x128xf32, #tpu.memory_space<vmem>>, vector<2x8x128xf32>,
    return
  }
  func.func @transform_0(%arg0: i32) -> i32 {
    %c0_i32 = arith.constant 0 : i32
    %c0_i32_0 = arith.constant 0 : i32
    return %c0_i32 : i32
  }
  func.func @transform_1(%arg0: i32) -> (i32, i32, i32) {
    %c0_i32 = arith.constant 0 : i32
    %c0_i32_0 = arith.constant 0 : i32
    %c0_i32_1 = arith.constant 0 : i32
    return %arg0, %c0_i32, %c0_i32_0 : i32, i32, i32
  }
  func.func @transform_2(%arg0: i32) -> (i32, i32, i32) {
    %c0_i32 = arith.constant 0 : i32
    %c0_i32_0 = arith.constant 0 : i32
    %c0_i32_1 = arith.constant 0 : i32
    return %arg0, %c0_i32, %c0_i32_0 : i32, i32, i32
  }
  func.func @transform_3(%arg0: i32) -> (i32, i32, i32) {
    %c0_i32 = arith.constant 0 : i32
    %c0_i32_0 = arith.constant 0 : i32
    %c0_i32_1 = arith.constant 0 : i32
    %c0_i32_2 = arith.constant 0 : i32
    return %c0_i32, %c0_i32_0, %c0_i32_1 : i32, i32, i32
  }
  func.func @transform_4(%arg0: i32) -> (i32, i32, i32) {
    %c0_i32 = arith.constant 0 : i32
    %c0_i32_0 = arith.constant 0 : i32
    %c0_i32_1 = arith.constant 0 : i32
    return %arg0, %c0_i32, %c0_i32_0 : i32, i32, i32
  }
}

</mosaic_0001>

<bundles_post_ra>
// kernel: sub.2
= control target key start
LH: loop header
LB: loop body
LE: loop exit
PB: predicated region body
PF: predicated region fallthrough
CT: control target
= control target key end

     0   :  { %s188_s0 = inlined_call_operand.vmem [shape: f32[1,4,16,16], index: 0, kind: input, shape index: {}]   ;;  %s189_s1 = inlined_call_operand.vmem [shape: f32[1,4,16,16], index: 1, kind: input, shape index: {}]   ;;  %s190_s2 = inlined_call_operand.vmem [shape: f32[1,4,16,16], index: 2, kind: output, shape index: {}]  }
   0x1   :  { %v3_v0 = vld [vmem:[%s188_s0] sm:$0xff]  ;;  %v80_v2 = vld [vmem:[%s188_s0 + $0x10] sm:$0xff]  ;;  %v89_v11 = vld [vmem:[%s188_s0 + $0x8] sm:$0xff] }
   0x2   :  { %v4_v1 = vld [vmem:[%s189_s1] sm:$0xff]  ;;  %v81_v4 = vld [vmem:[%s189_s1 + $0x10] sm:$0xff]  ;;  %v90_v13 = vld [vmem:[%s189_s1 + $0x8] sm:$0xff] }
   0x3   :  { %v7_v3 = vsub.f32 %v3_v0, %v4_v1  ;;  %v83_v5 = vld [vmem:[%s188_s0 + $0x20] sm:$0xff]  ;;  %v16_v7 = vsub.f32 %v80_v2, %v81_v4  ;;  %v86_v9 = vld [vmem:[%s188_s0 + $0x30] sm:$0xff]  ;;  %v92_v14 = vld [vmem:[%s188_s0 + $0x18] sm:$0xff]  ;;  %v46_v16 = vsub.f32 %v89_v11, %v90_v13 }
   0x4   :  { %v84_v6 = vld [vmem:[%s189_s1 + $0x20] sm:$0xff]  ;;  %v87_v10 = vld [vmem:[%s189_s1 + $0x30] sm:$0xff]  ;;  %v93_v15 = vld [vmem:[%s189_s1 + $0x18] sm:$0xff] }
   0x5   :  { %v26_v8 = vsub.f32 %v83_v5, %v84_v6  ;;  %9 = vst [vmem:[%s190_s2] sm:$0xff] %v7_v3  ;;  %v36_v12 = vsub.f32 %v86_v9, %v87_v10  ;;  %82 = vst [vmem:[%s190_s2 + $0x10] sm:$0xff] %v16_v7  ;;  %v56_v17 = vsub.f32 %v92_v14, %v93_v15  ;;  %v95_v18 = vld [vmem:[%s188_s0 + $0x28] sm:$0xff]  ;;  %v98_v20 = vld [vmem:[%s188_s0 + $0x38] sm:$0xff] }
   0x6   :  { %v96_v19 = vld [vmem:[%s189_s1 + $0x28] sm:$0xff]  ;;  %v99_v22 = vld [vmem:[%s189_s1 + $0x38] sm:$0xff]  ;;  %91 = vst [vmem:[%s190_s2 + $0x8] sm:$0xff] %v46_v16 }
   0x7   :  { %85 = vst [vmem:[%s190_s2 + $0x20] sm:$0xff] %v26_v8  ;;  %88 = vst [vmem:[%s190_s2 + $0x30] sm:$0xff] %v36_v12  ;;  %v66_v21 = vsub.f32 %v95_v18, %v96_v19  ;;  %v76_v23 = vsub.f32 %v98_v20, %v99_v22 }
   0x8   :  { %94 = vst [vmem:[%s190_s2 + $0x18] sm:$0xff] %v56_v17 }
   0x9   :  { %97 = vst [vmem:[%s190_s2 + $0x28] sm:$0xff] %v66_v21  ;;  %100 = vst [vmem:[%s190_s2 + $0x38] sm:$0xff] %v76_v23 }

// kernel: tdln_forward.1
= control target key start
LH: loop header
LB: loop body
LE: loop exit
PB: predicated region body
PF: predicated region fallthrough
CT: control target
= control target key end

     0   :  { %9 = vsyncpa [#allocation3], 0  ;;  %s258_s0 = inlined_call_operand.vmem [shape: f32[2], index: 0, kind: input, shape index: {}]   ;;  %s259_s1 = inlined_call_operand.vmem [shape: f32[2,1,1], index: 1, kind: input, shape index: {}]   ;;  %s260_s2 = inlined_call_operand.vmem [shape: f32[2,8,128], index: 2, kind: input, shape index: {}]   ;;  %s261_s3 = inlined_call_operand.vmem [shape: f32[4,8,128], index: 3, kind: input, shape index: {}]   ;;  %s262_s4 = inlined_call_operand.vmem [shape: f32[2,8,128], index: 4, kind: output, shape index: {}]  }
   0x1   :  { %s16_s17 = sshll.u32 %s258_s0, 4  ;;  %s17_s17 = int_to_ptr.vmem [resolvable:$true] %s16_s17 }
   0x2   :  { %s172_s18 = scalar_lea.vmem %s17_s17, 16  ;;  %p177_p1 = scmp.lt.s32.totalorder %s17_s17, %s17_s17 }
   0x3   :  { %p173_p0 = scmp.ne.s32.totalorder %s17_s17, %s172_s18  ;;  %p178_p2 = scmp.lt.s32.totalorder %s172_s18, %s172_s18 }
   0x5   :  { %p179_p3 = por %p178_p2, %p177_p1 }
   0x7   :  { %p180_p4 = pnand %p179_p3, %p173_p0 }
   0x9   :  { %183 = shalt.err (!%p180_p4)
}
   0xa   :  { %s186_s19 = smov [#allocation2]  }
   0xb   :  { %19 = dma.vmem_to_smem %s17_s17, 16, %s186_s19, [#allocation3]  }
   0xc   :  { %184 = dma.done.wait [#allocation3], 16  }
   0xd   :  { %185 = vsyncadd [#allocation3], 4294967280 }
   0xe   :  { %29 = sfence }
   0xf   :  { %v219_v0 = vld [vmem:[%s260_s2] sm:$0xff]  ;;  %v224_v1 = vld [vmem:[%s260_s2 + $0x8] sm:$0xff]  ;;  %s30_s23 = sld [smem:[#allocation2]]  ;;  %s150_s24 = sld [smem:[#allocation2 + $0x1]]  ;;  %v187_v3 = vmov 0   ;;  %v115_v18 = vlaneseq }
  0x10   :  { %54 = vadd.xlane.f32.xlu0 %v219_v0  ;;  %v70_v2 = vmul.f32 %v219_v0, %v219_v0  ;;  %159 = vset.pattern.permute.xlu1 %v187_v3  ;;  %v71_v4 = vmul.f32 %v224_v1, %v224_v1  ;;  %v32_v5 = vld [vmem:[%s259_s1] sm:$0x1]  ;;  %v33_v6 = vld [vmem:[%s259_s1 + $0x1] sm:$0x1] }
  0x11   :  { %158 = vset.pattern.permute.xlu0 %v187_v3  ;;  %v116_v20 = vshrl.u32 %v115_v18, 7  ;;  %v106_v3 = vld [vmem:[%s261_s3] sm:$0xff] }
  0x12   :  { %72 = vadd.xlane.f32.xlu1 %v70_v2 }
  0x13   :  { %v117_v21 = vsub.s32 0, %v116_v20 }
  0x14   :  { %56 = vadd.xlane.f32.xlu0 %v224_v1 }
  0x15   :  { %v34_v7 = vstv %s30_s23  ;;  %v37_v9 = vstv %s150_s24 }
  0x16   :  { %74 = vadd.xlane.f32.xlu1 %v71_v4  ;;  %v35_v8 = vmul.f32 %v34_v7, %v32_v5  ;;  %v36_v10 = vmul.f32 %v34_v7, %v33_v6  ;;  %v154_v6 = vld [vmem:[%s261_s3 + $0x10] sm:$0xff] }
  0x18   :  { %v38_v11 = vadd.f32 %v37_v9, %v35_v8  ;;  %v39_v12 = vadd.f32 %v37_v9, %v36_v10  ;;  %v153_v8 = vld [vmem:[%s261_s3 + $0x8] sm:$0xff] }
  0x1a   :  { %v151_v13 = vmul.f32 -1.442695, %v38_v11  ;;  %v152_v14 = vmul.f32 -1.442695, %v39_v12  ;;  %v155_v11 = vld [vmem:[%s261_s3 + $0x18] sm:$0xff] }
  0x1c   :  { %160 = vpow2.f32 %v151_v13 }
  0x1d   :  { %162 = vpow2.f32 %v152_v14 }
  0x26   :  { %v161_v15 = vpop.eup %160 }
  0x27   :  { %v163_v16 = vpop.eup %162  ;;  %v46_v17 = vadd.f32 1.0, %v161_v15 }
  0x28   :  { %v47_v19 = vadd.f32 1.0, %v163_v16 }
  0x29   :  { %164 = vrcp.f32 %v46_v17 }
  0x2a   :  { %166 = vrcp.f32 %v47_v19 }
  0x33   :  { %v165_v22 = vpop.eup %164 }
  0x34   :  { %v167_v23 = vpop.eup %166  ;;  %v118_v24 = vrot.slane %v165_v22, %v117_v21 }
  0x35   :  { %v122_v25 = vrot.slane %v167_v23, %v117_v21 }
  0x36   :  { %124 = vperm.xlu0 %158, %v118_v24  }
  0x37   :  { %128 = vperm.xlu1 %159, %v122_v25  }
  0x9d   :  { %v55_v26 = vpop.xlane.xlu0 %54 }
  0x9e   :  { %v58_v27 = vrot.slane %v55_v26, 4 }
  0x9f   :  { %v73_v28 = vpop.xlane.xlu1 %72 }
  0xa0   :  { %v59_v29 = vadd.f32 %v58_v27, %v55_v26  ;;  %v76_v30 = vrot.slane %v73_v28, 4 }
  0xa1   :  { %v57_v31 = vpop.xlane.xlu0 %56 }
  0xa2   :  { %v60_v32 = vrot.slane %v59_v29, 2  ;;  %v77_v33 = vadd.f32 %v76_v30, %v73_v28  ;;  %v64_v34 = vrot.slane %v57_v31, 4 }
  0xa3   :  { %v75_v35 = vpop.xlane.xlu1 %74 }
  0xa4   :  { %v61_v36 = vadd.f32 %v60_v32, %v59_v29  ;;  %v78_v37 = vrot.slane %v77_v33, 2  ;;  %v65_v38 = vadd.f32 %v64_v34, %v57_v31  ;;  %v82_v39 = vrot.slane %v75_v35, 4 }
  0xa6   :  { %v62_v40 = vrot.slane %v61_v36, 1  ;;  %v79_v41 = vadd.f32 %v78_v37, %v77_v33  ;;  %v66_v42 = vrot.slane %v65_v38, 2  ;;  %v83_v43 = vadd.f32 %v82_v39, %v75_v35 }
  0xa8   :  { %v63_v44 = vadd.f32 %v62_v40, %v61_v36  ;;  %v80_v45 = vrot.slane %v79_v41, 1  ;;  %v67_v46 = vadd.f32 %v66_v42, %v65_v38  ;;  %v84_v47 = vrot.slane %v83_v43, 2 }
  0xaa   :  { %v88_v48 = vmul.f32 0.0009765625, %v63_v44  ;;  %v81_v49 = vadd.f32 %v80_v45, %v79_v41  ;;  %v68_v50 = vrot.slane %v67_v46, 1  ;;  %v85_v51 = vadd.f32 %v84_v47, %v83_v43 }
  0xac   :  { %v92_v52 = vmul.f32 %v88_v48, %v88_v48  ;;  %v90_v53 = vmul.f32 0.0009765625, %v81_v49  ;;  %v69_v54 = vadd.f32 %v68_v50, %v67_v46  ;;  %v86_v55 = vrot.slane %v85_v51, 1 }
  0xad   :  { %v102_v12 = vsub.f32 %v219_v0, %v88_v48 }
  0xae   :  { %v94_v56 = vsub.f32 %v90_v53, %v92_v52  ;;  %v89_v57 = vmul.f32 0.0009765625, %v69_v54  ;;  %v87_v58 = vadd.f32 %v86_v55, %v85_v51 }
  0xb0   :  { %v96_v59 = vmax.f32 %v94_v56, 0.0  ;;  %v93_v60 = vmul.f32 %v89_v57, %v89_v57  ;;  %v91_v61 = vmul.f32 0.0009765625, %v87_v58  ;;  %v103_v19 = vsub.f32 %v224_v1, %v89_v57 }
  0xb2   :  { %v98_v62 = vadd.f32 1e-05, %v96_v59  ;;  %v95_v63 = vsub.f32 %v91_v61, %v93_v60 }
  0xb4   :  { %168 = vrsqrt.f32 %v98_v62  ;;  %v97_v2 = vmax.f32 %v95_v63, 0.0 }
  0xb5   :  { %v125_v4 = vpop.permute.xlu0 %124 }
  0xb6   :  { %v99_v5 = vadd.f32 1e-05, %v97_v2  ;;  %v131_v7 = vmul.f32 %v125_v4, %v106_v3  ;;  %v135_v9 = vmul.f32 %v154_v6, %v125_v4  ;;  %v129_v10 = vpop.permute.xlu1 %128 }
  0xb7   :  { %v132_v15 = vmul.f32 %v129_v10, %v106_v3  ;;  %v136_v21 = vmul.f32 %v154_v6, %v129_v10 }
  0xb8   :  { %170 = vrsqrt.f32 %v99_v5  ;;  %v133_v13 = vadd.f32 %v153_v8, %v131_v7  ;;  %v137_v17 = vadd.f32 %v155_v11, %v135_v9 }
  0xb9   :  { %v134_v20 = vadd.f32 %v153_v8, %v132_v15  ;;  %v138_v25 = vadd.f32 %v155_v11, %v136_v21 }
  0xbe   :  { %v169_v14 = vpop.eup %168 }
  0xbf   :  { %v104_v16 = vmul.f32 %v169_v14, %v102_v12 }
  0xc1   :  { %v139_v18 = vmul.f32 %v133_v13, %v104_v16 }
  0xc2   :  { %v171_v22 = vpop.eup %170 }
  0xc3   :  { %v141_v23 = vadd.f32 %v139_v18, %v137_v17  ;;  %v105_v24 = vmul.f32 %v171_v22, %v103_v19 }
  0xc5   :  { %143 = vst [vmem:[%s262_s4] sm:$0xff] %v141_v23  ;;  %v140_v26 = vmul.f32 %v134_v20, %v105_v24 }
  0xc7   :  { %v142_v0 = vadd.f32 %v140_v26, %v138_v25 }
  0xc9   :  { %144 = vst [vmem:[%s262_s4 + $0x8] sm:$0xff] %v142_v0 }
  0xca   :  { %149 = vsyncpa [#allocation3], 1 }

</bundles_post_ra>
